<compile_context>
chip_gen: v5e
topology: v5e:2x2
jax: 0.10.0
libtpu: 0.0.40
codegen_flags: <defaults>
</compile_context>

<pallas_src>
import math

import jax
import jax.numpy as jnp
from jax.experimental import pallas as pl
from jax.experimental.pallas import tpu as pltpu

BW_F = 8   # Config.bw_f  (activation bits)
BW_W = 6   # Config.bw_w  (weight bits)
POOL_LENGTH = 5
POOL_DIVISOR = 2 ** math.ceil(math.log2(POOL_LENGTH))  # ApproximateGlobalAveragePooling1D: 8
CONV_K = 3
CONV_PAD = 1
ACT_SCALE = float(2 ** (BW_F - 1))  # 128.0


def _round_up(n, m):
    return -(-n // m) * m


def _fake_quant(x, bits):
    # Symmetric fixed-point fake quantization, rounding_mode='UPWARD' (round half toward +inf).
    # TODO(synk): hannah trax-qat observers track running activation ranges; here we use the
    # static power-of-two fixed-point grid implied by the bit-width (scale = 2^(bits-1)).
    scale = 2.0 ** (bits - 1)
    q = jnp.floor(x * scale + 0.5)
    q = jnp.clip(q, -scale, scale - 1.0)
    return q / scale


def prepare_cell_pooling_weight(weight_oik, length=POOL_LENGTH):
    """Static per-model weight prep (call once at init; hoisted off the forward path).

    weight_oik: PyTorch Conv1d weight [Cout, Cin, K].
    Returns the pooling-folded, fake-quantized weight as bf16 [Cin*length, Cout] in
    Cin-MAJOR row order (row = cin*length + u), matching x_ncl.reshape(N, Cin*length)
    (a free view of the native NCL layout -- no wrapper transpose needed):
        Wsum[cin, u, :] = sum over taps k with 0 <= u + pad - k < length of wq[:, cin, k]
    so that  sum_t conv(xq)[:, :, t] == xq.reshape(N, Cin*L) @ Wsum   (valid: out_quant=False).
    """
    Cout, Cin, K = weight_oik.shape
    wq = _fake_quant(weight_oik.astype(jnp.float32), BW_W)   # [Cout, Cin, K]
    w_kio = jnp.transpose(wq, (2, 1, 0))                     # [K, Cin, Cout]
    per_u = []
    for u in range(length):
        acc = jnp.zeros((Cin, Cout), jnp.float32)
        for k in range(K):
            t = u + CONV_PAD - k          # conv output position that uses tap k of input u
            if 0 <= t < length:
                acc = acc + w_kio[k]
        per_u.append(acc)
    w_sum = jnp.stack(per_u, axis=1)                         # [Cin, L, Cout]  (Cin-major rows)
    # bf16 cast is exact: entries are sums of <=3 values on the 1/32 grid (|numerator| <= 96).
    return w_sum.reshape(Cin * length, Cout).astype(jnp.bfloat16)


def cell_pooling_kernel(x_ref, w_ref, o_ref):
    # x_ref: [TN, Cin*L] f32   w_ref: [Cin*L, Cout] bf16   o_ref: [TN, Cout] f32
    # Input fake-quant, kept on the INTEGER grid (values in [-128, 127]; exact in bf16).
    xi = jnp.clip(jnp.floor(x_ref[...] * ACT_SCALE + 0.5), -ACT_SCALE, ACT_SCALE - 1.0)
    # Exact bf16 MXU matmul with f32 accumulation:  acc = 128 * (xq @ Wsum) = 128 * 8 * pooled.
    acc = jnp.dot(xi.astype(jnp.bfloat16), w_ref[...], preferred_element_type=jnp.float32)
    # Output fake-quant with pooling divisor and both activation scales folded into ONE multiply:
    #   q = floor(pooled*128 + 0.5) = floor(acc/8 + 0.5);   o = q / 128.
    q = jnp.clip(jnp.floor(acc * (1.0 / POOL_DIVISOR) + 0.5), -ACT_SCALE, ACT_SCALE - 1.0)
    o_ref[...] = q * (1.0 / ACT_SCALE)


def _pick_batch_tile(n):
    if n < 8:
        return n   # full-dim block: whole array in one tile, no padding / OOB masking needed
    # Up to 1024 rows per tile (big DMAs, ~0.35us/step amortized; double-buffered footprint
    # ~3.8 MB << every generation's scoped-VMEM default), but capped near N/2 so the "parallel"
    # grid has >= 2 steps and both v7x TensorCores engage.
    return min(1024, _round_up(pl.cdiv(n, 2), 8))


def cell_pooling(x_ncl, w_prepped, length=POOL_LENGTH, xla_small_batch_threshold=0):
    """x_ncl: [N, Cin, L] (PyTorch NCL). w_prepped: [Cin*L, Cout] bf16 from prepare_cell_pooling_weight."""
    N, Cin, L = x_ncl.shape
    assert L == length
    KC, Cout = w_prepped.shape
    assert KC == Cin * L

    # Free view of the native NCL layout (row index = cin*L + u); NO transpose, NO pad, so x
    # makes exactly one HBM trip (the kernel's own read).
    x_flat = x_ncl.reshape(N, Cin * L).astype(jnp.float32)

    if N < xla_small_batch_threshold:
        # Tiny batches: pallas_call fixed overhead dwarfs the work; same folded math via XLA.
        xi = jnp.clip(jnp.floor(x_flat * ACT_SCALE + 0.5), -ACT_SCALE, ACT_SCALE - 1.0)
        acc = jnp.dot(xi.astype(jnp.bfloat16), w_prepped, preferred_element_type=jnp.float32)
        q = jnp.clip(jnp.floor(acc * (1.0 / POOL_DIVISOR) + 0.5), -ACT_SCALE, ACT_SCALE - 1.0)
        return (q * (1.0 / ACT_SCALE))[:, :, None]

    TN = _pick_batch_tile(N)
    # Trailing partial block (if any) is masked by Pallas: OOB reads give unspecified values in
    # rows that only feed discarded OOB output writes (rows are independent in the matmul).
    grid = pl.cdiv(N, TN)

    out = pl.pallas_call(
        cell_pooling_kernel,
        out_shape=jax.ShapeDtypeStruct((N, Cout), jnp.float32),
        grid_spec=pltpu.PrefetchScalarGridSpec(
            num_scalar_prefetch=0,
            grid=(grid,),
            in_specs=[
                pl.BlockSpec((TN, Cin * L), lambda i: (i, 0)),
                pl.BlockSpec((Cin * L, Cout), lambda i: (0, 0)),  # weight VMEM-resident across grid
            ],
            out_specs=pl.BlockSpec((TN, Cout), lambda i: (i, 0)),  # Cout=128 lane-dense output
        ),
        # TN <= 1024 keeps the double-buffered footprint well under scoped VMEM on v5e/v6e/v7x;
        # only set vmem_limit_bytes if TN is ever pushed to >= 4096 rows.
        compiler_params=pltpu.CompilerParams(dimension_semantics=("parallel",)),
    )(x_flat, w_prepped)

    # PyTorch pooling keeps the (now size-1) time dim: [N, Cout, 1]
    return out[:, :, None]


def _reference(x_ncl, weight_oik):
    """Pure-JAX reference of the original (un-folded) forward for a sanity check."""
    N, Cin, L = x_ncl.shape
    Cout, _, K = weight_oik.shape
    xq = _fake_quant(x_ncl.astype(jnp.float32), BW_F)             # [N, Cin, L]
    wq = _fake_quant(weight_oik.astype(jnp.float32), BW_W)        # [Cout, Cin, K]
    xp = jnp.pad(xq, ((0, 0), (0, 0), (CONV_PAD, CONV_PAD)))      # [N, Cin, L+2]
    conv = jnp.zeros((N, Cout, L), jnp.float32)
    for k in range(K):
        conv = conv + jnp.einsum('ncl,oc->nol', xp[:, :, k:k + L], wq[:, :, k],
                                 precision=jax.lax.Precision.HIGHEST)
    pooled = jnp.sum(conv, axis=2, keepdims=True) / POOL_DIVISOR  # [N, Cout, 1]
    return _fake_quant(pooled, BW_F)


if __name__ == "__main__":
    key = jax.random.PRNGKey(0)
    kx, kw, kx2 = jax.random.split(key, 3)

    Cin, Cout, L, K = 64, 128, POOL_LENGTH, CONV_K
    # Deterministic Conv1d-style init: U(-b, b), b = 1/sqrt(Cin * K)
    bound = 1.0 / math.sqrt(Cin * K)
    w = jax.random.uniform(kw, (Cout, Cin, K), minval=-bound, maxval=bound, dtype=jnp.float32)
    w_folded = prepare_cell_pooling_weight(w, L)   # static per model: done once, outside the call path

    # Module's own regime: tiny batch -> single full-array block.
    N = 2
    x = jax.random.normal(kx, (N, Cin, L), dtype=jnp.float32)
    y = cell_pooling(x, w_folded, L)
    jax.block_until_ready(y)
    assert y.shape == (N, Cout, 1) and y.dtype == jnp.float32
    # Kernel and reference are both exact on these quantization grids; the tolerance is just
    # slack (one 8-bit LSB) in case XLA lowers the reference einsum at reduced precision.
    assert float(jnp.max(jnp.abs(y - _reference(x, w)))) <= (1.0 / 128.0) + 1e-6

    # Larger, non-multiple-of-8 batch: exercises >= 2 "parallel" grid steps (v7x megacore)
    # and the pad-free masked tail block.
    N2 = 50
    x2 = jax.random.normal(kx2, (N2, Cin, L), dtype=jnp.float32)
    y2 = cell_pooling(x2, w_folded, L)
    jax.block_until_ready(y2)
    assert y2.shape == (N2, Cout, 1)
    assert float(jnp.max(jnp.abs(y2 - _reference(x2, w)))) <= (1.0 / 128.0) + 1e-6

    print("KERNEL_OK")
</pallas_src>

<mosaic_0001>
module attributes {stable_mosaic.version = 11 : i64} {
  func.func @cell_pooling_kernel(%arg0: i32, %arg1: memref<2x320xf32, #tpu.memory_space<vmem>>, %arg2: memref<320x128xbf16, #tpu.memory_space<vmem>>, %arg3: memref<2x128xf32, #tpu.memory_space<vmem>>) attributes {dimension_semantics = [#tpu.dimension_semantics<parallel>], iteration_bounds = array<i64: 1>, scalar_prefetch = 0 : i64, scratch_operands = 0 : i64, tpu.core_type = #tpu.core_type<tc>, window_params = [{transform_indices = @transform_0, window_bounds = array<i64: 2, 320>}, {pipeline_mode = #tpu.pipeline_mode<synchronous>, transform_indices = @transform_1, window_bounds = array<i64: 320, 128>}, {transform_indices = @transform_2, window_bounds = array<i64: 2, 128>}]} {
    %c0 = arith.constant 0 : index
    %c0_0 = arith.constant 0 : index
    %0 = vector.load %arg1[%c0, %c0_0] : memref<2x320xf32, #tpu.memory_space<vmem>>, vector<2x320xf32>
    %cst = arith.constant 1.280000e+02 : f32
    %1 = vector.broadcast %cst : f32 to vector<2x320xf32>
    %2 = arith.mulf %0, %1 : vector<2x320xf32>
    %cst_1 = arith.constant 5.000000e-01 : f32
    %3 = vector.broadcast %cst_1 : f32 to vector<2x320xf32>
    %4 = arith.addf %2, %3 : vector<2x320xf32>
    %5 = math.floor %4 : vector<2x320xf32>
    %cst_2 = arith.constant -1.280000e+02 : f32
    %cst_3 = arith.constant 1.270000e+02 : f32
    %6 = vector.broadcast %cst_2 : f32 to vector<2x320xf32>
    %7 = arith.maximumf %6, %5 : vector<2x320xf32>
    %8 = vector.broadcast %cst_3 : f32 to vector<2x320xf32>
    %9 = arith.minimumf %8, %7 : vector<2x320xf32>
    %10 = arith.truncf %9 : vector<2x320xf32> to vector<2x320xbf16>
    %c0_4 = arith.constant 0 : index
    %c0_5 = arith.constant 0 : index
    %11 = vector.load %arg2[%c0_4, %c0_5] : memref<320x128xbf16, #tpu.memory_space<vmem>>, vector<320x128xbf16>
    %cst_6 = arith.constant dense<0.000000e+00> : vector<2x128xf32>
    %12 = tpu.matmul %10, %11, %cst_6 {dimension_numbers = #tpu.dot_dimension_numbers<[1], [0], [0], [1], [0, 0, 1, 1], [], []>} : vector<2x320xbf16>, vector<320x128xbf16>, vector<2x128xf32> -> vector<2x128xf32>
    %cst_7 = arith.constant 1.250000e-01 : f32
    %13 = vector.broadcast %cst_7 : f32 to vector<2x128xf32>
    %14 = arith.mulf %12, %13 : vector<2x128xf32>
    %cst_8 = arith.constant 5.000000e-01 : f32
    %15 = vector.broadcast %cst_8 : f32 to vector<2x128xf32>
    %16 = arith.addf %14, %15 : vector<2x128xf32>
    %17 = math.floor %16 : vector<2x128xf32>
    %cst_9 = arith.constant -1.280000e+02 : f32
    %cst_10 = arith.constant 1.270000e+02 : f32
    %18 = vector.broadcast %cst_9 : f32 to vector<2x128xf32>
    %19 = arith.maximumf %18, %17 : vector<2x128xf32>
    %20 = vector.broadcast %cst_10 : f32 to vector<2x128xf32>
    %21 = arith.minimumf %20, %19 : vector<2x128xf32>
    %cst_11 = arith.constant 7.812500e-03 : f32
    %22 = vector.broadcast %cst_11 : f32 to vector<2x128xf32>
    %23 = arith.mulf %21, %22 : vector<2x128xf32>
    %c0_12 = arith.constant 0 : index
    %c0_13 = arith.constant 0 : index
    %24 = vector.load %arg3[%c0_12, %c0_13] : memref<2x128xf32, #tpu.memory_space<vmem>>, vector<2x128xf32>
    tpu.vector_store %arg3[%c0_12, %c0_13], %23 {strides = array<i32>} : memref<2x128xf32, #tpu.memory_space<vmem>>, vector<2x128xf32>,
    return
  }
  func.func @transform_0(%arg0: i32) -> (i32, i32) {
    %c0_i32 = arith.constant 0 : i32
    %c0_i32_0 = arith.constant 0 : i32
    return %arg0, %c0_i32 : i32, i32
  }
  func.func @transform_1(%arg0: i32) -> (i32, i32) {
    %c0_i32 = arith.constant 0 : i32
    %c0_i32_0 = arith.constant 0 : i32
    %c0_i32_1 = arith.constant 0 : i32
    return %c0_i32, %c0_i32_0 : i32, i32
  }
  func.func @transform_2(%arg0: i32) -> (i32, i32) {
    %c0_i32 = arith.constant 0 : i32
    %c0_i32_0 = arith.constant 0 : i32
    return %arg0, %c0_i32 : i32, i32
  }
}

</mosaic_0001>

<bundles_post_ra>
// kernel: tpu_custom_call.1
= control target key start
LH: loop header
LB: loop body
LE: loop exit
PB: predicated region body
PF: predicated region fallthrough
CT: control target
= control target key end

     0   :  { %7 = vsyncpa [#allocation3], 0  ;;  %s501_s0 = inlined_call_operand.hbm [shape: f32[2,320], index: 0, kind: input, shape index: {}]   ;;  %s502_s1 = inlined_call_operand.hbm [shape: bf16[320,128], index: 1, kind: input, shape index: {}]   ;;  %s503_s2 = inlined_call_operand.hbm [shape: f32[2,128], index: 2, kind: output, shape index: {}]  }
   0x1   :  { %8 = vsyncpa [#allocation6], 0 }
   0x2   :  { %9 = vsyncpa [#allocation4], 0  ;;  %s15_s11 = sshll.u32 %s501_s0, 4  ;;  %s472_s12 = smov [#allocation2]   ;;  %s16_s11 = int_to_ptr.hbm [resolvable:$true] %s15_s11 }
   0x3   :  { %s17_s13 = sshll.u32 %s472_s12, 4  ;;  %s25_s16 = sshll.u32 %s502_s1, 4  ;;  %s18_s13 = int_to_ptr.vmem [resolvable:$true] %s17_s13  ;;  %s26_s16 = int_to_ptr.hbm [resolvable:$true] %s25_s16 }
   0x4   :  { %20 = dma.hbm_to_vmem [thread:$0]  %s16_s11, 96, %s18_s13, [#allocation3]  }
   0x5   :  { %s473_s17 = smov [#allocation5]   ;;  %s474_s19 = smov 64  }
   0x6   :  { %s27_s18 = sshll.u32 %s473_s17, 4  ;;  %s475_s20 = smov 4   ;;  %s28_s18 = int_to_ptr.vmem [resolvable:$true] %s27_s18 }
   0x7   :  { %33 = dma.hbm_to_vmem [thread:$0]  %s26_s16, 2560, %s28_s18, [#allocation6], %s474_s19, %s474_s19, %s475_s20  }
   0x8   :  { %466 = dma.done.wait [#allocation3], 96  }
   0x9   :  { %467 = vsyncadd [#allocation3], 4294967200 }
   0xa   :  { %468 = dma.done.wait [#allocation6], 2560  }
   0xb   :  { %469 = vsyncadd [#allocation6], 4294964736  ;;  %v376_v0 = vld [vmem:[#allocation5 + $0x38] sm:$0xff]  ;;  %v375_v3 = vld [vmem:[#allocation5 + $0x30] sm:$0xff]  ;;  %vm220_vm0 = vcmask 523264   ;;  %s476_s0 = smov [#allocation7]  }
   0xc   :  { %v384_v1 = vld [vmem:[#allocation5 + $0x78] sm:$0xff]  ;;  %224 = vmatpush.bf16.msra.mxu0 %v376_v0  ;;  %v383_v4 = vld [vmem:[#allocation5 + $0x70] sm:$0xff]  ;;  %v374_v8 = vld [vmem:[#allocation5 + $0x28] sm:$0xff]  ;;  %s275_s1 = sshll.u32 %s476_s0, 4  ;;  %s277_s23 = sshll.u32 %s503_s2, 4  ;;  %s276_s1 = int_to_ptr.vmem [resolvable:$true] %s275_s1  ;;  %s278_s23 = int_to_ptr.hbm [resolvable:$true] %s277_s23 }
   0xd   :  { %v388_v2 = vld [vmem:[#allocation5 + $0x98] sm:$0xff]  ;;  %237 = vmatpush.bf16.msra.mxu1 %v384_v1  ;;  %v387_v5 = vld [vmem:[#allocation5 + $0x90] sm:$0xff]  ;;  %v382_v9 = vld [vmem:[#allocation5 + $0x68] sm:$0xff] }
   0xe   :  { %254 = vmatpush.bf16.msra.mxu2 %v388_v2  ;;  %v43_v6 = vld [vmem:[#allocation2] sm:$0x3f]  ;;  %v386_v10 = vld [vmem:[#allocation5 + $0x88] sm:$0xff]  ;;  %v373_v13 = vld [vmem:[#allocation5 + $0x20] sm:$0xff] }
   0xf   :  { %v44_v7 = vmul.f32 128.0, %v43_v6  ;;  %v381_v14 = vld [vmem:[#allocation5 + $0x60] sm:$0xff]  ;;  %v372_v18 = vld [vmem:[#allocation5 + $0x18] sm:$0xff]  ;;  %v371_v20 = vld [vmem:[#allocation5 + $0x10] sm:$0xff] }
  0x10   :  { %225 = vmatpush.bf16.msra.mxu0 %v375_v3  ;;  %v385_v15 = vld [vmem:[#allocation5 + $0x80] sm:$0xff]  ;;  %v380_v19 = vld [vmem:[#allocation5 + $0x58] sm:$0xff]  ;;  %v379_v21 = vld [vmem:[#allocation5 + $0x50] sm:$0xff] }
  0x11   :  { %238 = vmatpush.bf16.msra.mxu1 %v383_v4  ;;  %v45_v11 = vadd.f32 0.5, %v44_v7  ;;  %v370_v23 = vld [vmem:[#allocation5 + $0x8] sm:$0xff]  ;;  %v369_v26 = vld [vmem:[#allocation5] sm:$0xff] }
  0x12   :  { %255 = vmatpush.bf16.msra.mxu2 %v387_v5  ;;  %v378_v24 = vld [vmem:[#allocation5 + $0x48] sm:$0xff]  ;;  %v377_v27 = vld [vmem:[#allocation5 + $0x40] sm:$0xff] }
  0x13   :  { %v46_v12 = vfloor.f32 %v45_v11 }
  0x14   :  { %226 = vmatpush.bf16.msra.mxu0 %v374_v8 }
  0x15   :  { %239 = vmatpush.bf16.msra.mxu1 %v382_v9  ;;  %v47_v16 = vmax.f32 %v46_v12, -128.0 }
  0x16   :  { %256 = vmatpush.bf16.msra.mxu2 %v386_v10 }
  0x17   :  { %v48_v17 = vmin.f32 %v47_v16, 127.0 }
  0x18   :  { %227 = vmatpush.bf16.msra.mxu0 %v373_v13 }
  0x19   :  { %240 = vmatpush.bf16.msra.mxu1 %v381_v14  ;;  %50 = vst [vmem:[#allocation1] ss:$4 sm:$0xff] %v48_v17 }
  0x1a   :  { %257 = vmatpush.bf16.msra.mxu2 %v385_v15 }
  0x1c   :  { %228 = vmatpush.bf16.msra.mxu0 %v372_v18 }
  0x1d   :  { %241 = vmatpush.bf16.msra.mxu1 %v380_v19 }
  0x20   :  { %v53_v22 = vld.sshfl [vmem:[#allocation1 + $0x10] sm:$0xff pattern:$0x73625140]  ;;  %229 = vmatpush.bf16.msra.mxu0 %v371_v20  ;;  %v51_v28 = vld.sshfl [vmem:[#allocation1] sm:$0xff pattern:$0x73625140] }
  0x21   :  { %242 = vmatpush.bf16.msra.mxu1 %v379_v21  ;;  %v59_v25 = vpack.c.bf16 %v53_v22, %v53_v22  ;;  %v52_v29 = vld.sshfl [vmem:[#allocation1 + $0x8] sm:$0xff pattern:$0x73625140]  ;;  %v57_v30 = vpack.c.bf16 %v51_v28, %v51_v28 }
  0x22   :  { %v58_v31 = vpack.c.bf16 %v52_v29, %v52_v29 }
  0x23   :  { %368 = vmatmul.msk.bf16.vlgmr.msra.gmra.mxu2 %vm220_vm0, %v59_v25 }
  0x24   :  { %230 = vmatpush.bf16.msra.mxu0 %v370_v23 }
  0x25   :  { %243 = vmatpush.bf16.msra.mxu1 %v378_v24 }
  0x28   :  { %231 = vmatpush.bf16.msra.mxu0 %v369_v26 }
  0x29   :  { %244 = vmatpush.bf16.msra.mxu1 %v377_v27 }
  0x2b   :  { %232 = vmatmul.bf16.vlgmr.msra.gmra.mxu0 %v57_v30 }
  0x2c   :  { %245 = vmatmul.bf16.vlgmr.msra.gmra.mxu1 %v58_v31 }
  0xa6   :  { %v259_v32 = vpop.f32.mrf.mxu2 }
  0xa8   :  { %v233_v33 = vpop.f32.mrf.mxu0 }
  0xa9   :  { %v246_v34 = vpop.f32.mrf.mxu1 }
  0xaa   :  { %v247_v35 = vadd.f32 %v246_v34, %v233_v33 }
  0xac   :  { %v260_v36 = vadd.f32 %v259_v32, %v247_v35 }
  0xae   :  { %v263_v37 = vmul.f32 0.125, %v260_v36  ;;  %v261_v38 = vpop.f32.mrf.mxu2 }
  0xb0   :  { %v264_v39 = vadd.f32 0.5, %v263_v37  ;;  %v235_v40 = vpop.f32.mrf.mxu0 }
  0xb1   :  { %v248_v41 = vpop.f32.mrf.mxu1 }
  0xb2   :  { %v265_v42 = vfloor.f32 %v264_v39 }
  0xb4   :  { %v266_v43 = vmax.f32 %v265_v42, -128.0 }
  0xb6   :  { %v267_v44 = vmin.f32 %v266_v43, 127.0 }
  0xb8   :  { %v268_v45 = vmul.f32 0.0078125, %v267_v44 }
  0xba   :  { %269 = vst [vmem:[#allocation7] sm:$0x3] %v268_v45 }
  0xbb   :  { %280 = dma.vmem_to_hbm [thread:$0]  %s276_s1, 32, %s278_s23, [#allocation4]  }
  0xbc   :  { %470 = dma.done.wait [#allocation4], 32  }
  0xbd   :  { %471 = vsyncadd [#allocation4], 4294967264 }
  0xbe   :  { %285 = vsyncpa [#allocation3], 1 }
  0xbf   :  { %286 = vsyncpa [#allocation6], 1 }
  0xc0   :  { %287 = vsyncpa [#allocation4], 1 }

</bundles_post_ra>
